<compile_context>
chip_gen: v7x
topology: tpu7x:2x2x1
jax: 0.10.0
libtpu: 0.0.40
codegen_flags: <defaults>
</compile_context>

<pallas_src>
import collections
import functools
import math

import jax
import jax.numpy as jnp
from jax import lax
from jax.experimental import pallas as pl
from jax.experimental.pallas import tpu as pltpu


def _round_up(n, m):
    return ((n + m - 1) // m) * m


MLPMeta = collections.namedtuple(
    "MLPMeta",
    ["nhidden", "f_in", "f_out", "FP", "OUT_P",
     "compute_dtype", "precision", "batch_tile"],
)


def _mlp_fused_kernel(x_ref, wh_ref, bh_ref, wl_ref, bl_ref, o_ref, act_ref, *,
                      nhidden, precision):
    """Whole MLP for one batch tile; activations never leave VMEM.

    x_ref:   (TB, FP)        input tile (compute dtype)
    wh_ref:  (Lh, FP, FP)    stacked hidden weights (compute dtype)
    bh_ref:  (Lh, 1, FP)     stacked hidden biases (f32)
    wl_ref:  (FP, OUT_P)     final-layer weight (compute dtype)
    bl_ref:  (1, OUT_P)      final-layer bias (f32)
    o_ref:   (TB, OUT_P)     output tile (caller dtype)
    act_ref: (TB, FP)        hidden-activation scratch (compute dtype)
    """
    a = x_ref[...]                          # layer 0 fed directly from the input tile
    for l in range(nhidden):                # static unroll; hidden widths are uniform
        y = jnp.dot(a, wh_ref[l], preferred_element_type=jnp.float32,
                    precision=precision)
        y = y + bh_ref[l]                   # (1, FP) broadcasts over the batch tile
        act_ref[...] = jnp.maximum(y, 0.0).astype(act_ref.dtype)
        a = act_ref[...]
    y = jnp.dot(a, wl_ref[...], preferred_element_type=jnp.float32,
                precision=precision)
    y = y + bl_ref[...]
    o_ref[...] = y.astype(o_ref.dtype)


def prepare_mlp_params(params, *, compute_dtype=jnp.float32, precision=None,
                       batch_tile=256):
    """One-time prep: stack + zero-pad weights/biases into lane-dense slabs.

    params: list of (W (fi, fo), b (fo,)).  Returns (stacks, meta)."""
    L = len(params)
    nhidden = L - 1
    f_in = params[0][0].shape[0]
    f_out = params[-1][0].shape[1]

    # FP covers every layer's input width and every hidden layer's output width.
    widths = [w.shape[0] for (w, _) in params] + [w.shape[1] for (w, _) in params[:-1]]
    FP = _round_up(max(widths), 128)
    OUT_P = _round_up(f_out, 128)           # final layer gets its own (narrow) pad

    cdt = jnp.dtype(compute_dtype)
    Lh = max(nhidden, 1)                    # keep a dummy slot when nlayers == 1
    wh = jnp.zeros((Lh, FP, FP), dtype=cdt)
    bh = jnp.zeros((Lh, 1, FP), dtype=jnp.float32)
    for l in range(nhidden):
        w, b = params[l]
        fi, fo = w.shape
        wh = wh.at[l, :fi, :fo].set(w.astype(cdt))
        bh = bh.at[l, 0, :fo].set(b.astype(jnp.float32))
    w_last, b_last = params[-1]
    fi, fo = w_last.shape
    wl = jnp.zeros((FP, OUT_P), dtype=cdt).at[:fi, :fo].set(w_last.astype(cdt))
    bl = jnp.zeros((1, OUT_P), dtype=jnp.float32).at[0, :fo].set(
        b_last.astype(jnp.float32))

    if precision is None:
        # HIGHEST keeps the f32 path bit-tight; use HIGH or the bf16 compute
        # path when throughput matters more than exact-f32 matmuls.
        precision = (lax.Precision.HIGHEST if cdt == jnp.dtype(jnp.float32)
                     else lax.Precision.DEFAULT)

    meta = MLPMeta(nhidden=nhidden, f_in=f_in, f_out=f_out, FP=FP, OUT_P=OUT_P,
                   compute_dtype=cdt, precision=precision, batch_tile=batch_tile)
    return (wh, bh, wl, bl), meta


@functools.partial(jax.jit, static_argnames=("meta",))
def mlp_forward(x, stacks, meta):
    """x: (B, in_features) -> (B, out_features) in x.dtype."""
    wh, bh, wl, bl = stacks
    B = x.shape[0]
    cdt = meta.compute_dtype
    FP, OUT_P, nhidden = meta.FP, meta.OUT_P, meta.nhidden
    Lh = wh.shape[0]

    # Batch tiling: single (sublane-rounded) tile for small batches, otherwise
    # batch_tile-sized tiles (>= 2 grid steps -> both TCs busy on v7x).
    if B <= meta.batch_tile:
        TB = _round_up(max(B, 8), 8)
    else:
        TB = meta.batch_tile
    B_pad = _round_up(B, TB)

    x_pad = jnp.zeros((B_pad, FP), dtype=cdt).at[:B, :meta.f_in].set(x.astype(cdt))

    # Explicit VMEM budget: single-buffered weights/biases + double-buffered
    # activation I/O tiles + hidden scratch, with headroom.
    w_itemsize = cdt.itemsize
    out_itemsize = jnp.dtype(x.dtype).itemsize
    vmem_bytes = (wh.size * w_itemsize + bh.size * 4
                  + wl.size * w_itemsize + bl.size * 4
                  + 2 * TB * FP * w_itemsize
                  + 2 * TB * OUT_P * out_itemsize
                  + TB * FP * w_itemsize)
    vmem_limit = int(min(max(vmem_bytes * 1.25 + (2 << 20), 32 << 20), 127 << 20))

    kernel = functools.partial(_mlp_fused_kernel, nhidden=nhidden,
                               precision=meta.precision)

    out = pl.pallas_call(
        kernel,
        out_shape=jax.ShapeDtypeStruct((B_pad, OUT_P), x.dtype),
        grid_spec=pltpu.PrefetchScalarGridSpec(
            num_scalar_prefetch=0,
            grid=(B_pad // TB,),
            in_specs=[
                # activations: tiled over the batch (parallel) axis
                pl.BlockSpec((TB, FP), lambda i: (i, 0)),
                # grid-invariant weights/biases: single-buffered, stay resident
                pl.BlockSpec((Lh, FP, FP), lambda i: (0, 0, 0),
                             pipeline_mode=pl.Buffered(1)),
                pl.BlockSpec((Lh, 1, FP), lambda i: (0, 0, 0),
                             pipeline_mode=pl.Buffered(1)),
                pl.BlockSpec((FP, OUT_P), lambda i: (0, 0),
                             pipeline_mode=pl.Buffered(1)),
                pl.BlockSpec((1, OUT_P), lambda i: (0, 0),
                             pipeline_mode=pl.Buffered(1)),
            ],
            out_specs=pl.BlockSpec((TB, OUT_P), lambda i: (i, 0)),
            scratch_shapes=[pltpu.VMEM((TB, FP), cdt)],
        ),
        compiler_params=pltpu.CompilerParams(
            dimension_semantics=("parallel",),
            vmem_limit_bytes=vmem_limit,
        ),
    )(x_pad, wh, bh, wl, bl)

    return out[:B, :meta.f_out]


def init_mlp_params(key, in_features, out_features, nlayers, dtype=jnp.float32):
    """Deterministic init mirroring nn.Linear's U(-1/sqrt(fan_in), 1/sqrt(fan_in))."""
    params = []
    dims = [(in_features, in_features)] * (nlayers - 1) + [(in_features, out_features)]
    for (fi, fo) in dims:
        key, kw, kb = jax.random.split(key, 3)
        bound = 1.0 / math.sqrt(fi)
        w = jax.random.uniform(kw, (fi, fo), dtype=dtype, minval=-bound, maxval=bound)
        b = jax.random.uniform(kb, (fo,), dtype=dtype, minval=-bound, maxval=bound)
        params.append((w, b))
    return params


def mlp_reference(x, params, *, precision=lax.Precision.HIGHEST):
    """Pure-JAX reference for correctness checking."""
    n = len(params)
    for i, (w, b) in enumerate(params):
        x = jnp.dot(x, w, precision=precision) + b
        if i < n - 1:
            x = jnp.maximum(x, 0.0)
    return x


if __name__ == "__main__":
    key = jax.random.PRNGKey(0)
    batch = 8
    in_features = 32
    out_features = 16
    nlayers = 3

    key, kx, kp = jax.random.split(key, 3)
    x = jax.random.normal(kx, (batch, in_features), dtype=jnp.float32)
    params = init_mlp_params(kp, in_features, out_features, nlayers)

    ref = mlp_reference(x, params)

    # f32 compute path (exact-f32 accumulation) -> tight tolerance.
    stacks_f32, meta_f32 = prepare_mlp_params(params, compute_dtype=jnp.float32)
    out_f32 = jax.block_until_ready(mlp_forward(x, stacks_f32, meta_f32))
    assert out_f32.shape == (batch, out_features)
    assert out_f32.dtype == x.dtype
    assert jnp.allclose(out_f32, ref, atol=1e-5, rtol=1e-5)

    # bf16 compute / f32 accumulate path (the fast path on real workloads).
    stacks_bf16, meta_bf16 = prepare_mlp_params(params, compute_dtype=jnp.bfloat16)
    out_bf16 = jax.block_until_ready(mlp_forward(x, stacks_bf16, meta_bf16))
    assert out_bf16.shape == (batch, out_features)
    assert jnp.allclose(out_bf16, ref, atol=1e-1, rtol=1e-1)

    print("KERNEL_OK")
</pallas_src>

<mosaic_0001>
module attributes {stable_mosaic.version = 11 : i64} {
  func.func @_mlp_fused_kernel(%arg0: i32, %arg1: memref<8x128xf32, #tpu.memory_space<vmem>>, %arg2: memref<2x128x128xf32, #tpu.memory_space<vmem>>, %arg3: memref<2x1x128xf32, #tpu.memory_space<vmem>>, %arg4: memref<128x128xf32, #tpu.memory_space<vmem>>, %arg5: memref<1x128xf32, #tpu.memory_space<vmem>>, %arg6: memref<8x128xf32, #tpu.memory_space<vmem>>, %arg7: memref<8x128xf32, #tpu.memory_space<vmem>>) attributes {dimension_semantics = [#tpu.dimension_semantics<parallel>], iteration_bounds = array<i64: 1>, scalar_prefetch = 0 : i64, scratch_operands = 1 : i64, tpu.core_type = #tpu.core_type<tc>, window_params = [{transform_indices = @transform_0, window_bounds = array<i64: 8, 128>}, {pipeline_mode = #tpu.pipeline_mode<synchronous>, transform_indices = @transform_1, window_bounds = array<i64: 2, 128, 128>}, {pipeline_mode = #tpu.pipeline_mode<synchronous>, transform_indices = @transform_2, window_bounds = array<i64: 2, 1, 128>}, {pipeline_mode = #tpu.pipeline_mode<synchronous>, transform_indices = @transform_3, window_bounds = array<i64: 128, 128>}, {pipeline_mode = #tpu.pipeline_mode<synchronous>, transform_indices = @transform_4, window_bounds = array<i64: 1, 128>}, {transform_indices = @transform_5, window_bounds = array<i64: 8, 128>}]} {
    %c0 = arith.constant 0 : index
    %c0_0 = arith.constant 0 : index
    %0 = vector.load %arg1[%c0, %c0_0] : memref<8x128xf32, #tpu.memory_space<vmem>>, vector<8x128xf32>
    %c0_1 = arith.constant 0 : index
    %c0_2 = arith.constant 0 : index
    %c0_3 = arith.constant 0 : index
    %1 = vector.load %arg2[%c0_1, %c0_2, %c0_3] : memref<2x128x128xf32, #tpu.memory_space<vmem>>, vector<1x128x128xf32>
    %2 = vector.shape_cast %1 : vector<1x128x128xf32> to vector<128x128xf32>
    %cst = arith.constant dense<0.000000e+00> : vector<8x128xf32>
    %3 = tpu.matmul %0, %2, %cst {dimension_numbers = #tpu.dot_dimension_numbers<[1], [0], [0], [1], [0, 0, 1, 1], [], []>, precision = #tpu.contract_precision<fp32>} : vector<8x128xf32>, vector<128x128xf32>, vector<8x128xf32> -> vector<8x128xf32>
    %c0_4 = arith.constant 0 : index
    %c0_5 = arith.constant 0 : index
    %c0_6 = arith.constant 0 : index
    %4 = vector.load %arg3[%c0_4, %c0_5, %c0_6] : memref<2x1x128xf32, #tpu.memory_space<vmem>>, vector<1x1x128xf32>
    %5 = vector.shape_cast %4 : vector<1x1x128xf32> to vector<1x128xf32>
    %6 = vector.broadcast %5 : vector<1x128xf32> to vector<8x128xf32>
    %7 = arith.addf %3, %6 : vector<8x128xf32>
    %cst_7 = arith.constant 0.000000e+00 : f32
    %8 = vector.broadcast %cst_7 : f32 to vector<8x128xf32>
    %9 = arith.maximumf %7, %8 : vector<8x128xf32>
    %c0_8 = arith.constant 0 : index
    %c0_9 = arith.constant 0 : index
    %10 = vector.load %arg7[%c0_8, %c0_9] : memref<8x128xf32, #tpu.memory_space<vmem>>, vector<8x128xf32>
    tpu.vector_store %arg7[%c0_8, %c0_9], %9 {strides = array<i32>} : memref<8x128xf32, #tpu.memory_space<vmem>>, vector<8x128xf32>,
    %c0_10 = arith.constant 0 : index
    %c0_11 = arith.constant 0 : index
    %11 = vector.load %arg7[%c0_10, %c0_11] : memref<8x128xf32, #tpu.memory_space<vmem>>, vector<8x128xf32>
    %c1 = arith.constant 1 : index
    %c0_12 = arith.constant 0 : index
    %c0_13 = arith.constant 0 : index
    %12 = vector.load %arg2[%c1, %c0_12, %c0_13] : memref<2x128x128xf32, #tpu.memory_space<vmem>>, vector<1x128x128xf32>
    %13 = vector.shape_cast %12 : vector<1x128x128xf32> to vector<128x128xf32>
    %cst_14 = arith.constant dense<0.000000e+00> : vector<8x128xf32>
    %14 = tpu.matmul %11, %13, %cst_14 {dimension_numbers = #tpu.dot_dimension_numbers<[1], [0], [0], [1], [0, 0, 1, 1], [], []>, precision = #tpu.contract_precision<fp32>} : vector<8x128xf32>, vector<128x128xf32>, vector<8x128xf32> -> vector<8x128xf32>
    %c1_15 = arith.constant 1 : index
    %c0_16 = arith.constant 0 : index
    %c0_17 = arith.constant 0 : index
    %15 = vector.load %arg3[%c1_15, %c0_16, %c0_17] : memref<2x1x128xf32, #tpu.memory_space<vmem>>, vector<1x1x128xf32>
    %16 = vector.shape_cast %15 : vector<1x1x128xf32> to vector<1x128xf32>
    %17 = vector.broadcast %16 : vector<1x128xf32> to vector<8x128xf32>
    %18 = arith.addf %14, %17 : vector<8x128xf32>
    %cst_18 = arith.constant 0.000000e+00 : f32
    %19 = vector.broadcast %cst_18 : f32 to vector<8x128xf32>
    %20 = arith.maximumf %18, %19 : vector<8x128xf32>
    %c0_19 = arith.constant 0 : index
    %c0_20 = arith.constant 0 : index
    %21 = vector.load %arg7[%c0_19, %c0_20] : memref<8x128xf32, #tpu.memory_space<vmem>>, vector<8x128xf32>
    tpu.vector_store %arg7[%c0_19, %c0_20], %20 {strides = array<i32>} : memref<8x128xf32, #tpu.memory_space<vmem>>, vector<8x128xf32>,
    %c0_21 = arith.constant 0 : index
    %c0_22 = arith.constant 0 : index
    %22 = vector.load %arg7[%c0_21, %c0_22] : memref<8x128xf32, #tpu.memory_space<vmem>>, vector<8x128xf32>
    %c0_23 = arith.constant 0 : index
    %c0_24 = arith.constant 0 : index
    %23 = vector.load %arg4[%c0_23, %c0_24] : memref<128x128xf32, #tpu.memory_space<vmem>>, vector<128x128xf32>
    %cst_25 = arith.constant dense<0.000000e+00> : vector<8x128xf32>
    %24 = tpu.matmul %22, %23, %cst_25 {dimension_numbers = #tpu.dot_dimension_numbers<[1], [0], [0], [1], [0, 0, 1, 1], [], []>, precision = #tpu.contract_precision<fp32>} : vector<8x128xf32>, vector<128x128xf32>, vector<8x128xf32> -> vector<8x128xf32>
    %c0_26 = arith.constant 0 : index
    %c0_27 = arith.constant 0 : index
    %25 = vector.load %arg5[%c0_26, %c0_27] : memref<1x128xf32, #tpu.memory_space<vmem>>, vector<1x128xf32>
    %26 = vector.broadcast %25 : vector<1x128xf32> to vector<8x128xf32>
    %27 = arith.addf %24, %26 : vector<8x128xf32>
    %c0_28 = arith.constant 0 : index
    %c0_29 = arith.constant 0 : index
    %28 = vector.load %arg6[%c0_28, %c0_29] : memref<8x128xf32, #tpu.memory_space<vmem>>, vector<8x128xf32>
    tpu.vector_store %arg6[%c0_28, %c0_29], %27 {strides = array<i32>} : memref<8x128xf32, #tpu.memory_space<vmem>>, vector<8x128xf32>,
    return
  }
  func.func @transform_0(%arg0: i32) -> (i32, i32) {
    %c0_i32 = arith.constant 0 : i32
    %c0_i32_0 = arith.constant 0 : i32
    return %arg0, %c0_i32 : i32, i32
  }
  func.func @transform_1(%arg0: i32) -> (i32, i32, i32) {
    %c0_i32 = arith.constant 0 : i32
    %c0_i32_0 = arith.constant 0 : i32
    %c0_i32_1 = arith.constant 0 : i32
    %c0_i32_2 = arith.constant 0 : i32
    return %c0_i32, %c0_i32_0, %c0_i32_1 : i32, i32, i32
  }
  func.func @transform_2(%arg0: i32) -> (i32, i32, i32) {
    %c0_i32 = arith.constant 0 : i32
    %c0_i32_0 = arith.constant 0 : i32
    %c0_i32_1 = arith.constant 0 : i32
    %c0_i32_2 = arith.constant 0 : i32
    return %c0_i32, %c0_i32_0, %c0_i32_1 : i32, i32, i32
  }
  func.func @transform_3(%arg0: i32) -> (i32, i32) {
    %c0_i32 = arith.constant 0 : i32
    %c0_i32_0 = arith.constant 0 : i32
    %c0_i32_1 = arith.constant 0 : i32
    return %c0_i32, %c0_i32_0 : i32, i32
  }
  func.func @transform_4(%arg0: i32) -> (i32, i32) {
    %c0_i32 = arith.constant 0 : i32
    %c0_i32_0 = arith.constant 0 : i32
    %c0_i32_1 = arith.constant 0 : i32
    return %c0_i32, %c0_i32_0 : i32, i32
  }
  func.func @transform_5(%arg0: i32) -> (i32, i32) {
    %c0_i32 = arith.constant 0 : i32
    %c0_i32_0 = arith.constant 0 : i32
    return %arg0, %c0_i32 : i32, i32
  }
}

</mosaic_0001>

<bundles_post_ra>
// kernel: mlp_forward.1
= control target key start
LH: loop header
LB: loop body
LE: loop exit
PB: predicated region body
PF: predicated region fallthrough
CT: control target
= control target key end

     0   :  { %10 = vsyncpa [#allocation4], 0  ;;  %s4510_s0 = inlined_call_operand.vmem [shape: f32[8,128], index: 0, kind: input, shape index: {}]   ;;  %s4511_s1 = inlined_call_operand.hbm [shape: f32[2,128,128], index: 1, kind: input, shape index: {}]   ;;  %s4512_s2 = inlined_call_operand.vmem [shape: f32[2,1,128], index: 2, kind: input, shape index: {}]   ;;  %s4513_s3 = inlined_call_operand.hbm [shape: f32[128,128], index: 3, kind: input, shape index: {}]   ;;  %s4514_s4 = inlined_call_operand.vmem [shape: f32[1,128], index: 4, kind: input, shape index: {}]   ;;  %s4515_s5 = inlined_call_operand.hbm [shape: f32[8,128], index: 5, kind: output, shape index: {}]  }
   0x1   :  { %11 = vsyncpa [#allocation7], 0 }
   0x2   :  { %12 = vsyncpa [#allocation5], 0  ;;  %s3551_s18 = smov [#allocation3]   ;;  %s3479_s22 = scalar_lea.hbm %s4511_s1, 4096 }
   0x3   :  { %s20_s19 = sshll.u32 %s3551_s18, 4  ;;  %p3480_p0 = scmp.ne.s32.totalorder %s4511_s1, %s3479_s22  ;;  %s21_s19 = int_to_ptr.vmem [resolvable:$true] %s20_s19 }
   0x4   :  { %p3483_p1 = scmp.lt.u32.totalorder %s3479_s22, %s4511_s1 }
   0x6   :  { %p3485_p2 = pnand %p3483_p1, %p3480_p0 }
   0x8   :  { %3488 = shalt.err (!%p3485_p2)
}
   0x9   :  { %s3489_s27 = scalar_lea.vmem %s21_s19, 4096  ;;  %p3494_p4 = scmp.lt.s32.totalorder %s21_s19, %s21_s19 }
   0xa   :  { %p3490_p3 = scmp.ne.s32.totalorder %s21_s19, %s3489_s27  ;;  %p3495_p5 = scmp.lt.s32.totalorder %s3489_s27, %s3489_s27 }
   0xc   :  { %p3496_p6 = por %p3495_p5, %p3494_p4 }
   0xe   :  { %p3497_p7 = pnand %p3496_p6, %p3490_p3 }
  0x10   :  { %3500 = shalt.err (!%p3497_p7)
}
  0x11   :  { %s3552_s28 = smov 128   ;;  %s3553_s29 = smov 8  }
  0x12   :  { %26 = dma.hbm_to_vmem [thread:$0]  %s4511_s1, 4096, %s21_s19, [#allocation4], %s3552_s28, %s3552_s28, %s3553_s29  }
  0x13   :  { %s3554_s7 = smov [#allocation6]   ;;  %s3501_s11 = scalar_lea.hbm %s4513_s3, 2048 }
  0x14   :  { %s34_s8 = sshll.u32 %s3554_s7, 4  ;;  %p3502_p8 = scmp.ne.s32.totalorder %s4513_s3, %s3501_s11  ;;  %s35_s8 = int_to_ptr.vmem [resolvable:$true] %s34_s8 }
  0x15   :  { %p3505_p9 = scmp.lt.u32.totalorder %s3501_s11, %s4513_s3 }
  0x17   :  { %p3507_p10 = pnand %p3505_p9, %p3502_p8 }
  0x19   :  { %3510 = shalt.err (!%p3507_p10)
}
  0x1a   :  { %s3511_s16 = scalar_lea.vmem %s35_s8, 2048  ;;  %p3516_p12 = scmp.lt.s32.totalorder %s35_s8, %s35_s8 }
  0x1b   :  { %p3512_p11 = scmp.ne.s32.totalorder %s35_s8, %s3511_s16  ;;  %p3517_p13 = scmp.lt.s32.totalorder %s3511_s16, %s3511_s16 }
  0x1d   :  { %p3518_p0 = por %p3517_p13, %p3516_p12 }
  0x1f   :  { %p3519_p1 = pnand %p3518_p0, %p3512_p11 }
  0x21   :  { %3522 = shalt.err (!%p3519_p1)
}
  0x22   :  { %40 = dma.hbm_to_vmem [thread:$0]  %s4513_s3, 2048, %s35_s8, [#allocation7], %s3552_s28, %s3552_s28, %s3553_s29  }
  0x23   :  { %3545 = dma.done.wait [#allocation4], 4096  }
  0x24   :  { %3546 = vsyncadd [#allocation4], 4294963200 }
  0x25   :  { %3547 = dma.done.wait [#allocation7], 2048  }
  0x26   :  { %3548 = vsyncadd [#allocation7], 4294965248  ;;  %v4532_v0 = vmov 0.0|0.0   ;;  %vm3556_vm0 = vmmov 0   ;;  %v4526_v1 = vmov 0.0   ;;  %v50_v2 = vld [vmem:[#allocation3] sm:$0xff] }
  0x27   :  { %3007 = vmatprep.subr.bf16.mxu1 %v4532_v0  ;;  %3079 = vmatprep.subr.bf16.mxu0 %v4532_v0  ;;  %v51_v3 = vld [vmem:[#allocation3 + $0x8] sm:$0xff]  ;;  %v52_v4 = vld [vmem:[#allocation3 + $0x10] sm:$0xff]  ;;  %v74_v5 = vand.u32 4294901760, %v50_v2  ;;  %v53_v7 = vld [vmem:[#allocation3 + $0x18] sm:$0xff]  ;;  %s3558_s23 = smov [#allocation8]  }
  0x28   :  { %2409 = vmatprep.mubr.msk.f32.mxu1 %vm3556_vm0, %v4526_v1  ;;  %2514 = vmatprep.mubr.msk.f32.mxu0 %vm3556_vm0, %v4526_v1  ;;  %v77_v6 = vand.u32 4294901760, %v51_v3  ;;  %v80_v8 = vand.u32 4294901760, %v52_v4  ;;  %v83_v9 = vand.u32 4294901760, %v53_v7  ;;  %v54_v10 = vld [vmem:[#allocation3 + $0x20] sm:$0xff]  ;;  %v55_v11 = vld [vmem:[#allocation3 + $0x28] sm:$0xff]  ;;  %v3627_v16 = vld [vmem:[#allocation3 + $0x30] sm:$0xff] }
  0x29   :  { %v86_v14 = vand.u32 4294901760, %v54_v10  ;;  %v89_v15 = vand.u32 4294901760, %v55_v11  ;;  %v3629_v17 = vld [vmem:[#allocation3 + $0x38] sm:$0xff]  ;;  %v92_v19 = vand.u32 4294901760, %v3627_v16  ;;  %v58_v21 = vld [vmem:[#allocation3 + $0x40] sm:$0xff]  ;;  %v59_v22 = vld [vmem:[#allocation3 + $0x48] sm:$0xff]  ;;  %v3650_v27 = vsub.f32 %v50_v2, %v74_v5 }
  0x2a   :  { %v3619_v12 = vpack.c.bf16 %v77_v6, %v74_v5  ;;  %v3623_v13 = vpack.c.bf16 %v83_v9, %v80_v8  ;;  %v95_v20 = vand.u32 4294901760, %v3629_v17  ;;  %v98_v24 = vand.u32 4294901760, %v58_v21  ;;  %v49_v26 = vld [vmem:[%s4510_s0] sm:$0xff]  ;;  %v3656_v29 = vld [vmem:[#allocation3 + $0x50] sm:$0xff]  ;;  %v3658_v30 = vld [vmem:[#allocation3 + $0x58] sm:$0xff]  ;;  %s2057_s24 = sshll.u32 %s3558_s23, 4  ;;  %s2058_s24 = int_to_ptr.vmem [resolvable:$true] %s2057_s24 }
  0x2b   :  { %v3633_v18 = vpack.c.bf16 %v89_v15, %v86_v14  ;;  %v101_v25 = vand.u32 4294901760, %v59_v22  ;;  %v3652_v28 = vsub.f32 %v51_v3, %v77_v6  ;;  %v3660_v31 = vand.u32 4294901760, %v49_v26  ;;  %v3674_v37 = vld [vmem:[#allocation3 + $0x60] sm:$0xff]  ;;  %v3676_v38 = vld [vmem:[#allocation3 + $0x68] sm:$0xff]  ;;  %v3695_v46 = vld [vmem:[#allocation3 + $0x70] sm:$0xff]  ;;  %s3523_s25 = scalar_lea.vmem %s2058_s24, 128  ;;  %p3528_p3 = scmp.lt.s32.totalorder %s2058_s24, %s2058_s24 }
  0x2c   :  { %3009 = vmatpush3.bf16.msra.mxu1 %v3619_v12  ;;  %3081 = vmatpush3.bf16.msra.mxu0 %v3619_v12  ;;  %v3645_v23 = vpack.c.bf16 %v95_v20, %v92_v19  ;;  %v3662_v32 = vsub.f32 %v52_v4, %v80_v8  ;;  %v104_v34 = vand.u32 4294901760, %v3656_v29  ;;  %v107_v35 = vand.u32 4294901760, %v3658_v30  ;;  %v3697_v47 = vld [vmem:[#allocation3 + $0x78] sm:$0xff]  ;;  %v3728_v63 = vld [vmem:[#allocation3 + $0x80] sm:$0xff]  ;;  %v3740_v4 = vld [vmem:[#allocation3 + $0x88] sm:$0xff]  ;;  %p3524_p2 = scmp.ne.s32.totalorder %s2058_s24, %s3523_s25  ;;  %p3529_p4 = scmp.lt.s32.totalorder %s3523_s25, %s3523_s25 }
  0x2d   :  { %3010 = vmatprep.subr.bf16.mxu1 %v4532_v0  ;;  %3082 = vmatprep.subr.bf16.mxu0 %v4532_v0  ;;  %v3666_v33 = vpack.c.bf16 %v101_v25, %v98_v24  ;;  %v3670_v36 = vsub.f32 %v53_v7, %v83_v9  ;;  %v167_v39 = vand.u32 4294901760, %v3650_v27  ;;  %v174_v40 = vand.u32 4294901760, %v3652_v28  ;;  %v3753_v9 = vld [vmem:[#allocation3 + $0x90] sm:$0xff] }
  0x2e   :  { %v3680_v41 = vsub.f32 %v54_v10, %v86_v14  ;;  %v3683_v42 = vsub.f32 %v49_v26, %v3660_v31  ;;  %v3691_v43 = vpack.c.bf16 %v107_v35, %v104_v34  ;;  %v110_v44 = vand.u32 4294901760, %v3674_v37  ;;  %v3755_v10 = vld [vmem:[#allocation3 + $0x98] sm:$0xff]  ;;  %p3530_p5 = por %p3529_p4, %p3528_p3 }
  0x2f   :  { %v4528_v45 = vand.u32 4294901760, %v3676_v38  ;;  %v181_v48 = vand.u32 4294901760, %v3662_v32  ;;  %v3700_v49 = vsub.f32 %v55_v11, %v89_v15  ;;  %v168_v50 = vsub.f32 %v3650_v27, %v167_v39 }
  0x30   :  { %3012 = vmatpush3.bf16.msra.mxu1 %v3623_v13  ;;  %3084 = vmatpush3.bf16.msra.mxu0 %v3623_v13  ;;  %v175_v51 = vsub.f32 %v3652_v28, %v174_v40  ;;  %v188_v52 = vand.u32 4294901760, %v3670_v36  ;;  %v4519_v53 = vand.u32 4294901760, %v3695_v46  ;;  %v4517_v54 = vand.u32 4294901760, %v3697_v47  ;;  %p3531_p6 = pnand %p3530_p5, %p3524_p2 }
  0x31   :  { %3013 = vmatprep.subr.bf16.mxu1 %v4532_v0  ;;  %3085 = vmatprep.subr.bf16.mxu0 %v4532_v0  ;;  %v156_v55 = vand.u32 4294901760, %v3683_v42  ;;  %v3716_v56 = vpack.c.bf16 %v4528_v45, %v110_v44  ;;  %v3721_v57 = vsub.f32 %v3662_v32, %v181_v48  ;;  %v4523_v58 = vand.u32 4294901760, %v3680_v41 }
  0x32   :  { %v169_v59 = vand.u32 4294901760, %v168_v50  ;;  %v176_v60 = vand.u32 4294901760, %v175_v51  ;;  %v189_v61 = vsub.f32 %v3670_v36, %v188_v52  ;;  %v4521_v62 = vand.u32 4294901760, %v3700_v49  ;;  %v3784_v51 = vld [vmem:[#allocation3 + $0xb8] sm:$0xff] }
  0x33   :  { %v3733_v2 = vsub.f32 %v3627_v16, %v92_v19  ;;  %v3738_v3 = vsub.f32 %v3629_v17, %v95_v20  ;;  %v3742_v5 = vsub.f32 %v58_v21, %v98_v24  ;;  %v3744_v6 = vsub.f32 %v59_v22, %v101_v25  ;;  %v3764_v17 = vld [vmem:[#allocation3 + $0xa0] sm:$0xff]  ;;  %v3766_v19 = vld [vmem:[#allocation3 + $0xa8] sm:$0xff]  ;;  %v3774_v25 = vld [vmem:[#allocation3 + $0xb0] sm:$0xff] }
  0x34   :  { %3015 = vmatpush3.bf16.msra.mxu1 %v3633_v18  ;;  %3087 = vmatpush3.bf16.msra.mxu0 %v3633_v18  ;;  %v3750_v7 = vpack.c.bf16 %v4517_v54, %v4519_v53  ;;  %v157_v8 = vsub.f32 %v3683_v42, %v156_v55  ;;  %v3104_v11 = vpack.c.bf16 %v174_v40, %v167_v39  ;;  %v183_v14 = vand.u32 4294901760, %v3721_v57 }
  0x35   :  { %3016 = vmatprep.subr.bf16.mxu1 %v4532_v0  ;;  %3088 = vmatprep.subr.bf16.mxu0 %v4532_v0  ;;  %v196_v15 = vsub.f32 %v3680_v41, %v4523_v58  ;;  %v4516_v16 = vand.u32 4294901760, %v3728_v63  ;;  %v3032_v20 = vpack.c.bf16 %v176_v60, %v169_v59  ;;  %v190_v21 = vand.u32 4294901760, %v189_v61 }
  0x36   :  { %v203_v22 = vsub.f32 %v3700_v49, %v4521_v62  ;;  %v4518_v24 = vand.u32 4294901760, %v3740_v4  ;;  %v209_v26 = vand.u32 4294901760, %v3733_v2  ;;  %v4520_v40 = vand.u32 4294901760, %v3753_v9 }
  0x37   :  { %v3780_v39 = vsub.f32 %v3728_v63, %v4516_v16  ;;  %v4522_v50 = vand.u32 4294901760, %v3755_v10  ;;  %v158_v57 = vand.u32 4294901760, %v157_v8  ;;  %v4524_v60 = vand.u32 4294901760, %v3764_v17 }
  0x38   :  { %3018 = vmatpush3.bf16.msra.mxu1 %v3645_v23  ;;  %3090 = vmatpush3.bf16.msra.mxu0 %v3645_v23  ;;  %v3789_v59 = vsub.f32 %v3740_v4, %v4518_v24  ;;  %v4525_v61 = vand.u32 4294901760, %v3766_v19  ;;  %v216_v16 = vand.u32 4294901760, %v3738_v3  ;;  %v3799_v54 = vsub.f32 %v3753_v9, %v4520_v40 }
  0x39   :  { %3019 = vmatprep.subr.bf16.mxu1 %v4532_v0  ;;  %3091 = vmatprep.subr.bf16.mxu0 %v4532_v0  ;;  %v3804_v8 = vsub.f32 %v3755_v10, %v4522_v50  ;;  %v4530_v24 = vand.u32 4294901760, %v3774_v25  ;;  %v3812_v53 = vsub.f32 %v3764_v17, %v4524_v60  ;;  %v4529_v62 = vand.u32 4294901760, %v3784_v51 }
  0x3a   :  { %v3817_v40 = vsub.f32 %v3766_v19, %v4525_v61  ;;  %v3823_v50 = vsub.f32 %v3656_v29, %v104_v34  ;;  %v3828_v58 = vsub.f32 %v3658_v30, %v107_v35  ;;  %v3107_v60 = vpack.c.bf16 %v188_v52, %v181_v48 }
  0x3b   :  { %v3835_v61 = vsub.f32 %v3774_v25, %v4530_v24  ;;  %v197_v1 = vand.u32 4294901760, %v196_v15  ;;  %v204_v45 = vand.u32 4294901760, %v203_v22  ;;  %v223_v29 = vand.u32 4294901760, %v3742_v5 }
  0x3c   :  { %3021 = vmatpush3.bf16.msra.mxu1 %v3666_v33  ;;  %3093 = vmatpush3.bf16.msra.mxu0 %v3666_v33  ;;  %v3841_v34 = vsub.f32 %v3784_v51, %v4529_v62  ;;  %v3035_v30 = vpack.c.bf16 %v190_v21, %v183_v14  ;;  %v210_v35 = vsub.f32 %v3733_v2, %v209_v26  ;;  %v230_v52 = vand.u32 4294901760, %v3744_v6 }
  0x3d   :  { %3022 = vmatprep.subr.bf16.mxu1 %v4532_v0  ;;  %3094 = vmatprep.subr.bf16.mxu0 %v4532_v0  ;;  %4551 = vst [vmem:[#allocation12_spill] sm:$0xff] %v3835_v61  ;;  %v217_v48 = vsub.f32 %v3738_v3, %v216_v16  ;;  %v4553_v15 = vand.u32 4294901760, %v3676_v38  ;;  %v4554_v14 = vmov 0.0   ;;  %v4555_v21 = vand.u32 4294901760, %v3680_v41 }
  0x3e   :  { %4552 = vst [vmem:[#allocation13_spill] sm:$0xff] %v3841_v34  ;;  %v4556_v22 = vand.u32 4294901760, %v3700_v49  ;;  %v231_v62 = vsub.f32 %v3744_v6, %v230_v52  ;;  %v244_v24 = vand.u32 4294901760, %v3828_v58 }
  0x40   :  { %3024 = vmatpush3.bf16.msra.mxu1 %v3691_v43  ;;  %3096 = vmatpush3.bf16.msra.mxu0 %v3691_v43  ;;  %v245_v61 = vsub.f32 %v3828_v58, %v244_v24 }
  0x41   :  { %3025 = vmatprep.subr.bf16.mxu1 %v4532_v0  ;;  %3097 = vmatprep.subr.bf16.mxu0 %v4532_v0 }
  0x44   :  { %3027 = vmatpush3.bf16.msra.mxu1 %v3716_v56  ;;  %3099 = vmatpush3.bf16.msra.mxu0 %v3716_v56 }
  0x45   :  { %3028 = vmatprep.subr.bf16.mxu1 %v4532_v0  ;;  %3100 = vmatprep.subr.bf16.mxu0 %v4532_v0 }
  0x48   :  { %3030 = vmatpush3.bf16.msra.mxu1 %v3750_v7  ;;  %3102 = vmatpush3.bf16.msra.mxu0 %v3750_v7 }
  0x49   :  { %3031 = vmatprep.subr.bf16.mxu1 %v4532_v0  ;;  %3103 = vmatprep.subr.bf16.mxu0 %v4532_v0 }
  0x4b   :  { %2410 = vmatmul.mubr.f32.vlgmr.msra.gmra.mrb[0].mxu1 %v158_v57  ;;  %2515 = vmatmul.mubr.f32.vlgmr.msra.gmra.mrb[0].mxu0 %v156_v55  ;;  %v3851_v55 = vsub.f32 %v3674_v37, %v110_v44  ;;  %v3110_v57 = vpack.c.bf16 %v4556_v22, %v4555_v21  ;;  %v224_v37 = vsub.f32 %v3742_v5, %v223_v29  ;;  %v237_v44 = vand.u32 4294901760, %v3823_v50 }
  0x4c   :  { %3033 = vmatpush3.bf16.msra.mxu1 %v3032_v20  ;;  %3105 = vmatpush3.bf16.msra.mxu0 %v3104_v11  ;;  %v3856_v11 = vsub.f32 %v3676_v38, %v4553_v15  ;;  %v3038_v20 = vpack.c.bf16 %v204_v45, %v197_v1  ;;  %v211_v38 = vand.u32 4294901760, %v210_v35  ;;  %v218_v15 = vand.u32 4294901760, %v217_v48 }
  0x4d   :  { %3034 = vmatprep.subr.bf16.mxu1 %v4532_v0  ;;  %3106 = vmatprep.subr.bf16.mxu0 %v4532_v0  ;;  %v4557_v1 = vand.u32 4294901760, %v3695_v46  ;;  %v4558_v21 = vand.u32 4294901760, %v3697_v47  ;;  %v225_v35 = vand.u32 4294901760, %v224_v37  ;;  %v238_v48 = vsub.f32 %v3823_v50, %v237_v44 }
  0x4e   :  { %2444 = vmatprep.mubr.msk.f32.mxu1 %vm3556_vm0, %v4554_v14  ;;  %2549 = vmatprep.mubr.msk.f32.mxu0 %vm3556_vm0, %v4554_v14  ;;  %v251_v22 = vand.u32 4294901760, %v3851_v55  ;;  %v3041_v34 = vpack.c.bf16 %v218_v15, %v211_v38  ;;  %v3119_v38 = vpack.c.bf16 %v244_v24, %v237_v44 }
  0x4f   :  { %v3875_v45 = vsub.f32 %v3695_v46, %v4557_v1  ;;  %v258_v46 = vand.u32 4294901760, %v3856_v11  ;;  %v4559_v1 = vmov 0.0|0.0  }
  0x50   :  { %3036 = vmatpush3.bf16.msra.mxu1 %v3035_v30  ;;  %3108 = vmatpush3.bf16.msra.mxu0 %v3107_v60  ;;  %v3880_v30 = vsub.f32 %v3697_v47, %v4558_v21  ;;  %v3113_v60 = vpack.c.bf16 %v216_v16, %v209_v26  ;;  %v3116_v47 = vpack.c.bf16 %v230_v52, %v223_v29  ;;  %v239_v21 = vand.u32 4294901760, %v238_v48 }
  0x51   :  { %3037 = vmatprep.subr.bf16.mxu1 %v4532_v0  ;;  %3109 = vmatprep.subr.bf16.mxu0 %v4532_v0  ;;  %v232_v0 = vand.u32 4294901760, %v231_v62  ;;  %v252_v16 = vsub.f32 %v3851_v55, %v251_v22  ;;  %v265_v26 = vand.u32 4294901760, %v3875_v45  ;;  %v259_v62 = vsub.f32 %v3856_v11, %v258_v46 }
  0x52   :  { %v272_v37 = vand.u32 4294901760, %v3880_v30 }
  0x53   :  { %v253_v15 = vand.u32 4294901760, %v252_v16  ;;  %v260_v52 = vand.u32 4294901760, %v259_v62  ;;  %v266_v48 = vsub.f32 %v3875_v45, %v265_v26 }
  0x54   :  { %3039 = vmatpush3.bf16.msra.mxu1 %v3038_v20  ;;  %3111 = vmatpush3.bf16.msra.mxu0 %v3110_v57  ;;  %v3044_v20 = vpack.c.bf16 %v232_v0, %v225_v35  ;;  %v246_v57 = vand.u32 4294901760, %v245_v61  ;;  %v3122_v61 = vpack.c.bf16 %v258_v46, %v251_v22  ;;  %v3125_v44 = vpack.c.bf16 %v272_v37, %v265_v26  ;;  %v733_v46 = vld [vmem:[#allocation3 + $0xf8] sm:$0xff] }
  0x55   :  { %3040 = vmatprep.subr.bf16.mxu1 %v4559_v1  ;;  %3112 = vmatprep.subr.bf16.mxu0 %v4559_v1  ;;  %v3050_v0 = vpack.c.bf16 %v260_v52, %v253_v15  ;;  %v3059_v22 = vpack.c.bf16 %v3670_v36, %v3662_v32  ;;  %v4560_v32 = vand.u32 4294901760, %v3728_v63  ;;  %v4567_v63 = vand.u32 4294901760, %v3784_v51  ;;  %v731_v51 = vld [vmem:[#allocation3 + $0xe8] sm:$0xff] }
  0x56   :  { %v3047_v29 = vpack.c.bf16 %v246_v57, %v239_v21  ;;  %v788_v16 = vand.u32 4294901760, %v733_v46  ;;  %v836_v26 = vand.u32 4294901760, %v3780_v39 }
  0x58   :  { %3042 = vmatpush3.bf16.msra.mxu1 %v3041_v34  ;;  %3114 = vmatpush3.bf16.msra.mxu0 %v3113_v60  ;;  %v273_v34 = vsub.f32 %v3880_v30, %v272_v37  ;;  %v267_v60 = vand.u32 4294901760, %v266_v48  ;;  %v837_v62 = vsub.f32 %v3780_v39, %v836_v26 }
  0x59   :  { %3043 = vmatprep.subr.bf16.mxu1 %v4559_v1  ;;  %3115 = vmatprep.subr.bf16.mxu0 %v4559_v1 }
  0x5a   :  { %v274_v35 = vand.u32 4294901760, %v273_v34 }
  0x5c   :  { %3045 = vmatpush3.bf16.msra.mxu1 %v3044_v20  ;;  %3117 = vmatpush3.bf16.msra.mxu0 %v3116_v47  ;;  %v3053_v24 = vpack.c.bf16 %v274_v35, %v267_v60  ;;  %v3056_v47 = vpack.c.bf16 %v3652_v28, %v3650_v27  ;;  %v3062_v27 = vpack.c.bf16 %v3700_v49, %v3680_v41  ;;  %v4562_v41 = vand.u32 4294901760, %v3753_v9  ;;  %v728_v9 = vld [vmem:[#allocation3 + $0xd0] sm:$0xff] }
  0x5d   :  { %3046 = vmatprep.subr.bf16.mxu1 %v4559_v1  ;;  %3118 = vmatprep.subr.bf16.mxu0 %v4559_v1  ;;  %v3077_v28 = vpack.c.bf16 %v3880_v30, %v3875_v45  ;;  %v732_v30 = vld [vmem:[#allocation3 + $0xf0] sm:$0xff]  ;;  %v843_v20 = vand.u32 4294901760, %v3789_v59  ;;  %v838_v60 = vand.u32 4294901760, %v837_v62 }
  0x5e   :  { %v785_v21 = vand.u32 4294901760, %v732_v30 }
  0x5f   :  { %v844_v37 = vsub.f32 %v3789_v59, %v843_v20 }
  0x60   :  { %3048 = vmatpush3.bf16.msra.mxu1 %v3047_v29  ;;  %3120 = vmatpush3.bf16.msra.mxu0 %v3119_v38  ;;  %v4002_v57 = vpack.c.bf16 %v788_v16, %v785_v21 }
  0x61   :  { %3049 = vmatprep.subr.bf16.mxu1 %v4559_v1  ;;  %3121 = vmatprep.subr.bf16.mxu0 %v4559_v1  ;;  %v845_v35 = vand.u32 4294901760, %v844_v37 }
  0x64   :  { %3051 = vmatpush3.bf16.msra.mxu1 %v3050_v0  ;;  %3123 = vmatpush3.bf16.msra.mxu0 %v3122_v61  ;;  %v4023_v0 = vsub.f32 %v732_v30, %v785_v21  ;;  %v4025_v61 = vsub.f32 %v733_v46, %v788_v16 }
  0x65   :  { %3052 = vmatprep.subr.bf16.mxu1 %v4559_v1  ;;  %3124 = vmatprep.subr.bf16.mxu0 %v4559_v1 }
  0x68   :  { %3054 = vmatpush3.bf16.msra.mxu1 %v3053_v24  ;;  %3126 = vmatpush3.bf16.msra.mxu0 %v3125_v44  ;;  %v850_v24 = vand.u32 4294901760, %v3799_v54  ;;  %v857_v44 = vand.u32 4294901760, %v3804_v8 }
  0x69   :  { %3055 = vmatprep.subr.bf16.mxu1 %v4559_v1  ;;  %3127 = vmatprep.subr.bf16.mxu0 %v4559_v1 }
  0x6b   :  { %2445 = vmatmul.mubr.f32.vlgmr.msra.gmra.mrb[0].mxu1 %v3660_v31  ;;  %2550 = vmatmul.mubr.f32.vlgmr.msra.gmra.mrb[0].mxu0 %v3660_v31 }
  0x6c   :  { %3057 = vmatpush3.bf16.msra.mxu1 %v3056_v47  ;;  %3129 = vmatpush3.bf16.msra.mxu0 %v3619_v12  ;;  %v3065_v12 = vpack.c.bf16 %v3738_v3, %v3733_v2  ;;  %v726_v3 = vld [vmem:[#allocation3 + $0xc0] sm:$0xff]  ;;  %v4030_v47 = vpack.c.bf16 %v845_v35, %v838_v60 }
  0x6d   :  { %3058 = vmatprep.subr.bf16.mxu1 %v4559_v1  ;;  %3130 = vmatprep.subr.bf16.mxu0 %v4559_v1 }
  0x6e   :  { %2479 = vmatprep.mubr.msk.f32.mxu1 %vm3556_vm0, %v4554_v14  ;;  %2584 = vmatprep.mubr.msk.f32.mxu0 %vm3556_vm0, %v4554_v14 }
  0x70   :  { %3060 = vmatpush3.bf16.msra.mxu1 %v3059_v22  ;;  %3132 = vmatpush3.bf16.msra.mxu0 %v3623_v13  ;;  %v3068_v13 = vpack.c.bf16 %v3744_v6, %v3742_v5  ;;  %v767_v5 = vand.u32 4294901760, %v726_v3  ;;  %v851_v22 = vsub.f32 %v3799_v54, %v850_v24 }
  0x71   :  { %3061 = vmatprep.subr.bf16.mxu1 %v4559_v1  ;;  %3133 = vmatprep.subr.bf16.mxu0 %v4559_v1 }
  0x72   :  { %v4010_v38 = vsub.f32 %v726_v3, %v767_v5 }
  0x74   :  { %3063 = vmatpush3.bf16.msra.mxu1 %v3062_v27  ;;  %3135 = vmatpush3.bf16.msra.mxu0 %v3633_v18  ;;  %v3071_v18 = vpack.c.bf16 %v3828_v58, %v3823_v50  ;;  %v4566_v58 = vand.u32 4294901760, %v3774_v25  ;;  %v730_v50 = vld [vmem:[#allocation3 + $0xe0] sm:$0xff]  ;;  %v858_v27 = vsub.f32 %v3804_v8, %v857_v44 }
  0x75   :  { %3064 = vmatprep.subr.bf16.mxu1 %v4559_v1  ;;  %3136 = vmatprep.subr.bf16.mxu0 %v4559_v1 }
  0x76   :  { %v3983_v2 = vpack.c.bf16 %v4567_v63, %v4566_v58  ;;  %v4569_v58 = vld [vmem:[#allocation13_spill] sm:$0xff] }
  0x77   :  { %v4543_v63 = vand.u32 4294901760, %v4569_v58 }
  0x78   :  { %3066 = vmatpush3.bf16.msra.mxu1 %v3065_v12  ;;  %3138 = vmatpush3.bf16.msra.mxu0 %v3645_v23  ;;  %v3074_v23 = vpack.c.bf16 %v3856_v11, %v3851_v55  ;;  %v779_v55 = vand.u32 4294901760, %v730_v50  ;;  %v782_v11 = vand.u32 4294901760, %v731_v51  ;;  %v4546_v12 = vand.u32 4294901760, %v3812_v53 }
  0x79   :  { %3067 = vmatprep.subr.bf16.mxu1 %v4559_v1  ;;  %3139 = vmatprep.subr.bf16.mxu0 %v4559_v1 }
  0x7a   :  { %v3996_v45 = vpack.c.bf16 %v782_v11, %v779_v55  ;;  %v4019_v48 = vsub.f32 %v730_v50, %v779_v55  ;;  %v4021_v34 = vsub.f32 %v731_v51, %v782_v11 }
  0x7c   :  { %3069 = vmatpush3.bf16.msra.mxu1 %v3068_v13  ;;  %3141 = vmatpush3.bf16.msra.mxu0 %v3666_v33  ;;  %v4561_v33 = vand.u32 4294901760, %v3740_v4  ;;  %v727_v4 = vld [vmem:[#allocation3 + $0xc8] sm:$0xff]  ;;  %v4545_v13 = vand.u32 4294901760, %v3817_v40  ;;  %v4538_v35 = vand.u32 4294901760, %v4019_v48 }
  0x7d   :  { %3070 = vmatprep.subr.bf16.mxu1 %v4559_v1  ;;  %3142 = vmatprep.subr.bf16.mxu0 %v4559_v1  ;;  %v770_v6 = vand.u32 4294901760, %v727_v4 }
  0x7e   :  { %v3952_v36 = vpack.c.bf16 %v4561_v33, %v4560_v32  ;;  %v872_v32 = vsub.f32 %v3817_v40, %v4545_v13 }
  0x7f   :  { %v4012_v15 = vsub.f32 %v727_v4, %v770_v6 }
  0x80   :  { %3072 = vmatpush3.bf16.msra.mxu1 %v3071_v18  ;;  %3144 = vmatpush3.bf16.msra.mxu0 %v3691_v43  ;;  %v4563_v43 = vand.u32 4294901760, %v3755_v10  ;;  %v729_v10 = vld [vmem:[#allocation3 + $0xd8] sm:$0xff]  ;;  %v852_v18 = vand.u32 4294901760, %v851_v22  ;;  %v4537_v22 = vand.u32 4294901760, %v4021_v34 }
  0x81   :  { %3073 = vmatprep.subr.bf16.mxu1 %v4559_v1  ;;  %3145 = vmatprep.subr.bf16.mxu0 %v4559_v1 }
  0x82   :  { %v3963_v49 = vpack.c.bf16 %v4563_v43, %v4562_v41  ;;  %v873_v43 = vand.u32 4294901760, %v872_v32 }
  0x84   :  { %3075 = vmatpush3.bf16.msra.mxu1 %v3074_v23  ;;  %3147 = vmatpush3.bf16.msra.mxu0 %v3716_v56  ;;  %v859_v23 = vand.u32 4294901760, %v858_v27 }
  0x85   :  { %3076 = vmatprep.subr.bf16.mxu1 %v4559_v1  ;;  %3148 = vmatprep.subr.bf16.mxu0 %v4559_v1 }
  0x86   :  { %v4046_v33 = vpack.c.bf16 %v859_v23, %v852_v18  ;;  %v921_v18 = vsub.f32 %v4019_v48, %v4538_v35  ;;  %v928_v23 = vsub.f32 %v4021_v34, %v4537_v22 }
  0x88   :  { %3078 = vmatpush3.bf16.msra.mxu1 %v3077_v28  ;;  %3150 = vmatpush3.bf16.msra.mxu0 %v3750_v7  ;;  %v3988_v7 = vpack.c.bf16 %v770_v6, %v767_v5  ;;  %v865_v28 = vsub.f32 %v3812_v53, %v4546_v12  ;;  %v886_v5 = vsub.f32 %v4569_v58, %v4543_v63  ;;  %v929_v32 = vand.u32 4294901760, %v928_v23 }
  0x89   :  { %3151 = vmatprep.subr.bf16.mxu1 %v4559_v1  ;;  %3295 = vmatprep.subr.bf16.mxu0 %v4559_v1  ;;  %v3221_v23 = vpack.c.bf16 %v4025_v61, %v4023_v0 }
  0x8a   :  { %v866_v41 = vand.u32 4294901760, %v865_v28  ;;  %v922_v28 = vand.u32 4294901760, %v921_v18  ;;  %v3218_v18 = vpack.c.bf16 %v4021_v34, %v4019_v48 }
  0x8b   :  { %2480 = vmatmul.mubr.f32.vlgmr.msra.gmra.mrb[0].mxu1 %v3683_v42  ;;  %2585 = vmatmul.mubr.f32.vlgmr.msra.gmra.mrb[0].mxu0 %v3660_v31  ;;  %v4564_v31 = vand.u32 4294901760, %v3764_v17  ;;  %v4565_v42 = vand.u32 4294901760, %v3766_v19  ;;  %v773_v17 = vand.u32 4294901760, %v728_v9  ;;  %v776_v19 = vand.u32 4294901760, %v729_v10 }
  0x8c   :  { %3153 = vmatpush3.bf16.msra.mxu1 %v3952_v36  ;;  %2619 = vmatprep.mubr.msk.f32.mxu1 %vm3556_vm0, %v4554_v14  ;;  %v3182_v3 = vpack.c.bf16 %v873_v43, %v866_v41  ;;  %v4536_v41 = vand.u32 4294901760, %v4023_v0  ;;  %v4535_v43 = vand.u32 4294901760, %v4025_v61 }
  0x8d   :  { %3154 = vmatprep.subr.bf16.mxu1 %v4559_v1  ;;  %2829 = vmatprep.mubr.msk.f32.mxu0 %vm3556_vm0, %v4554_v14  ;;  %v3975_v56 = vpack.c.bf16 %v4565_v42, %v4564_v31  ;;  %v3992_v25 = vpack.c.bf16 %v776_v19, %v773_v17  ;;  %v4014_v29 = vsub.f32 %v728_v9, %v773_v17  ;;  %v4568_v31 = vld [vmem:[#allocation12_spill] sm:$0xff]  ;;  %v887_v9 = vand.u32 4294901760, %v886_v5 }
  0x8e   :  { %v4016_v52 = vsub.f32 %v729_v10, %v776_v19  ;;  %v4544_v42 = vand.u32 4294901760, %v4568_v31  ;;  %v4542_v10 = vand.u32 4294901760, %v4010_v38  ;;  %v4541_v17 = vand.u32 4294901760, %v4012_v15 }
  0x8f   :  { %v4540_v30 = vand.u32 4294901760, %v4014_v29  ;;  %v935_v5 = vsub.f32 %v4023_v0, %v4536_v41 }
  0x90   :  { %3156 = vmatpush3.bf16.msra.mxu1 %v3963_v49  ;;  %v879_v4 = vsub.f32 %v4568_v31, %v4544_v42  ;;  %v893_v50 = vsub.f32 %v4010_v38, %v4542_v10  ;;  %v900_v51 = vsub.f32 %v4012_v15, %v4541_v17  ;;  %v4539_v46 = vand.u32 4294901760, %v4016_v52  ;;  %v1395_v10 = vld [vmem:[#allocation6 + $0x48] sm:$0xff] }
  0x91   :  { %3157 = vmatprep.subr.bf16.mxu1 %v4559_v1  ;;  %v907_v16 = vsub.f32 %v4014_v29, %v4540_v30 }
  0x92   :  { %v880_v6 = vand.u32 4294901760, %v879_v4  ;;  %v894_v55 = vand.u32 4294901760, %v893_v50  ;;  %v901_v11 = vand.u32 4294901760, %v900_v51  ;;  %v914_v62 = vsub.f32 %v4016_v52, %v4539_v46 }
  0x93   :  { %v908_v37 = vand.u32 4294901760, %v907_v16  ;;  %v3194_v4 = vpack.c.bf16 %v929_v32, %v922_v28  ;;  %v3206_v16 = vpack.c.bf16 %v3817_v40, %v3812_v53  ;;  %v2067_v28 = vld [vmem:[%s4512_s2] ss:$0 sm:$0xff] }
  0x94   :  { %3159 = vmatpush3.bf16.msra.mxu1 %v3975_v56  ;;  %v3185_v19 = vpack.c.bf16 %v887_v9, %v880_v6  ;;  %v3188_v21 = vpack.c.bf16 %v901_v11, %v894_v55  ;;  %v915_v60 = vand.u32 4294901760, %v914_v62  ;;  %v942_v6 = vsub.f32 %v4025_v61, %v4535_v43 }
  0x95   :  { %3160 = vmatprep.subr.bf16.mxu1 %v4559_v1  ;;  %v936_v9 = vand.u32 4294901760, %v935_v5  ;;  %v3200_v55 = vpack.c.bf16 %v3789_v59, %v3780_v39  ;;  %v3203_v11 = vpack.c.bf16 %v3804_v8, %v3799_v54  ;;  %v3209_v62 = vpack.c.bf16 %v4569_v58, %v4568_v31 }
  0x96   :  { %v3191_v27 = vpack.c.bf16 %v915_v60, %v908_v37  ;;  %v943_v50 = vand.u32 4294901760, %v942_v6  ;;  %v3212_v37 = vpack.c.bf16 %v4012_v15, %v4010_v38  ;;  %v3215_v60 = vpack.c.bf16 %v4016_v52, %v4014_v29 }
  0x97   :  { %v4570_v39 = vand.u32 4294901760, %v3812_v53  ;;  %v4571_v59 = vand.u32 4294901760, %v3817_v40  ;;  %v4573_v54 = vand.u32 4294901760, %v4569_v58  ;;  %v4576_v53 = vand.u32 4294901760, %v4014_v29 }
  0x98   :  { %3162 = vmatpush3.bf16.msra.mxu1 %v3983_v2  ;;  %v3197_v51 = vpack.c.bf16 %v943_v50, %v936_v9  ;;  %v4577_v40 = vand.u32 4294901760, %v4016_v52  ;;  %v4579_v58 = vand.u32 4294901760, %v4021_v34  ;;  %v1399_v52 = vld [vmem:[#allocation6 + $0x68] sm:$0xff]  ;;  %v1400_v34 = vld [vmem:[#allocation6 + $0x70] sm:$0xff] }
  0x99   :  { %3163 = vmatprep.subr.bf16.mxu1 %v4559_v1 }
  0x9c   :  { %3165 = vmatpush3.bf16.msra.mxu1 %v3988_v7 }
  0x9d   :  { %3166 = vmatprep.subr.bf16.mxu1 %v4559_v1 }
  0xa0   :  { %3168 = vmatpush3.bf16.msra.mxu1 %v3992_v25 }
  0xa1   :  { %3169 = vmatprep.subr.bf16.mxu1 %v4559_v1 }
  0xa4   :  { %3171 = vmatpush3.bf16.msra.mxu1 %v3996_v45 }
  0xa5   :  { %3172 = vmatprep.subr.bf16.mxu1 %v4559_v1 }
  0xa8   :  { %3174 = vmatpush3.bf16.msra.mxu1 %v4002_v57 }
  0xa9   :  { %3175 = vmatprep.subr.bf16.mxu1 %v4559_v1 }
 0x15e   :  { %v415_v32 = vpop.f32.mrb[0].mxu1  ;;  %v710_v5 = vpop.f32.mrb[0].mxu0 }
 0x15f   :  { %v3439_v6 = vadd.f32 %v2067_v28, %v415_v32  ;;  %v2481_v9 = vpop.f32.mrb[1].mxu1  ;;  %v2586_v50 = vpop.f32.mrb[1].mxu0  ;;  %v1392_v28 = vld [vmem:[#allocation6 + $0x30] sm:$0xff]  ;;  %v1393_v32 = vld [vmem:[#allocation6 + $0x38] sm:$0xff] }
 0x161   :  { %v3440_v43 = vadd.f32 %v3439_v6, %v710_v5  ;;  %v1394_v5 = vld [vmem:[#allocation6 + $0x40] sm:$0xff] }
 0x163   :  { %v714_v41 = vmax.f32 %v3440_v43, 0.0 }
 0x165   :  { %v4107_v22 = vand.u32 4294901760, %v714_v41 }
 0x167   :  { %v4110_v35 = vsub.f32 %v714_v41, %v4107_v22  ;;  %v1391_v41 = vld [vmem:[#allocation6 + $0x28] sm:$0xff] }
 0x169   :  { %v825_v46 = vand.u32 4294901760, %v4110_v35 }
 0x16b   :  { %v826_v30 = vsub.f32 %v4110_v35, %v825_v46 }
 0x16d   :  { %v827_v17 = vand.u32 4294901760, %v826_v30  ;;  %v1389_v30 = vld [vmem:[#allocation6 + $0x18] sm:$0xff] }
 0x16e   :  { %v1419_v43 = vand.u32 4294901760, %v1389_v30 }
 0x16f   :  { %2620 = vmatmul.mubr.f32.vlgmr.msra.gmra.mrb[2].mxu1 %v827_v17 }
 0x170   :  { %3177 = vmatpush3.bf16.msra.mxu1 %v4030_v47  ;;  %2654 = vmatprep.mubr.msk.f32.mxu1 %vm3556_vm0, %v4554_v14  ;;  %v1386_v47 = vld [vmem:[#allocation6] sm:$0xff]  ;;  %v4142_v42 = vsub.f32 %v1389_v30, %v1419_v43 }
 0x171   :  { %3178 = vmatprep.subr.bf16.mxu1 %v4559_v1  ;;  %v1410_v17 = vand.u32 4294901760, %v1386_v47 }
 0x174   :  { %3180 = vmatpush3.bf16.msra.mxu1 %v4046_v33  ;;  %v1387_v33 = vld [vmem:[#allocation6 + $0x8] sm:$0xff] }
 0x175   :  { %3181 = vmatprep.subr.bf16.mxu1 %v4559_v1 }
 0x178   :  { %3183 = vmatpush3.bf16.msra.mxu1 %v3182_v3  ;;  %v1388_v3 = vld [vmem:[#allocation6 + $0x10] sm:$0xff] }
 0x179   :  { %3184 = vmatprep.subr.bf16.mxu1 %v4559_v1 }
 0x17c   :  { %3186 = vmatpush3.bf16.msra.mxu1 %v3185_v19  ;;  %v1413_v19 = vand.u32 4294901760, %v1387_v33 }
 0x17d   :  { %3187 = vmatprep.subr.bf16.mxu1 %v4559_v1 }
 0x17e   :  { %v4132_v6 = vpack.c.bf16 %v1413_v19, %v1410_v17  ;;  %v4136_v9 = vsub.f32 %v1387_v33, %v1413_v19  ;;  %v1431_v33 = vand.u32 4294901760, %v1393_v32 }
 0x180   :  { %3189 = vmatpush3.bf16.msra.mxu1 %v3188_v21  ;;  %v1416_v21 = vand.u32 4294901760, %v1388_v3  ;;  %3297 = vmatpush3.bf16.msra.mxu0 %v4132_v6  ;;  %v4156_v30 = vsub.f32 %v1393_v32, %v1431_v33 }
 0x181   :  { %3190 = vmatprep.subr.bf16.mxu1 %v4559_v1  ;;  %3298 = vmatprep.subr.bf16.mxu0 %v4559_v1 }
 0x182   :  { %v4138_v50 = vsub.f32 %v1388_v3, %v1416_v21  ;;  %v4140_v63 = vpack.c.bf16 %v1419_v43, %v1416_v21  ;;  %v1437_v3 = vand.u32 4294901760, %v1395_v10 }
 0x184   :  { %3192 = vmatpush3.bf16.msra.mxu1 %v3191_v27  ;;  %v1390_v27 = vld [vmem:[#allocation6 + $0x20] sm:$0xff]  ;;  %3300 = vmatpush3.bf16.msra.mxu0 %v4140_v63 }
 0x185   :  { %3193 = vmatprep.subr.bf16.mxu1 %v4559_v1  ;;  %3301 = vmatprep.subr.bf16.mxu0 %v4559_v1 }
 0x188   :  { %3195 = vmatpush3.bf16.msra.mxu1 %v3194_v4  ;;  %v1422_v4 = vand.u32 4294901760, %v1390_v27 }
 0x189   :  { %3196 = vmatprep.subr.bf16.mxu1 %v4559_v1 }
 0x18a   :  { %v4144_v13 = vsub.f32 %v1390_v27, %v1422_v4  ;;  %v4160_v27 = vsub.f32 %v1395_v10, %v1437_v3 }
 0x18c   :  { %3198 = vmatpush3.bf16.msra.mxu1 %v3197_v51  ;;  %v1425_v51 = vand.u32 4294901760, %v1391_v41 }
 0x18d   :  { %3199 = vmatprep.subr.bf16.mxu1 %v4559_v1 }
 0x18e   :  { %v4150_v12 = vsub.f32 %v1391_v41, %v1425_v51 }
 0x18f   :  { %2655 = vmatmul.mubr.f32.vlgmr.msra.gmra.mrb[2].mxu1 %v4107_v22 }
 0x190   :  { %3201 = vmatpush3.bf16.msra.mxu1 %v3200_v55  ;;  %2689 = vmatprep.mubr.msk.f32.mxu1 %vm3556_vm0, %v4554_v14  ;;  %v4134_v55 = vsub.f32 %v1386_v47, %v1410_v17  ;;  %v1428_v47 = vand.u32 4294901760, %v1392_v28  ;;  %v1434_v17 = vand.u32 4294901760, %v1394_v5 }
 0x191   :  { %3202 = vmatprep.subr.bf16.mxu1 %v4559_v1 }
 0x192   :  { %v4154_v19 = vsub.f32 %v1392_v28, %v1428_v47  ;;  %v4158_v21 = vsub.f32 %v1394_v5, %v1434_v17  ;;  %v4174_v10 = vpack.c.bf16 %v1431_v33, %v1428_v47 }
 0x194   :  { %3204 = vmatpush3.bf16.msra.mxu1 %v3203_v11  ;;  %v4166_v11 = vpack.c.bf16 %v1425_v51, %v1422_v4 }
 0x195   :  { %3205 = vmatprep.subr.bf16.mxu1 %v4559_v1 }
 0x196   :  { %3303 = vmatpush3.bf16.msra.mxu0 %v4166_v11 }
 0x197   :  { %3304 = vmatprep.subr.bf16.mxu0 %v4559_v1 }
 0x198   :  { %3207 = vmatpush3.bf16.msra.mxu1 %v3206_v16  ;;  %v4182_v16 = vpack.c.bf16 %v1437_v3, %v1434_v17 }
 0x199   :  { %3208 = vmatprep.subr.bf16.mxu1 %v4559_v1 }
 0x19a   :  { %3306 = vmatpush3.bf16.msra.mxu0 %v4174_v10 }
 0x19b   :  { %3307 = vmatprep.subr.bf16.mxu0 %v4559_v1 }
 0x19c   :  { %3210 = vmatpush3.bf16.msra.mxu1 %v3209_v62  ;;  %v3248_v62 = vpack.c.bf16 %v843_v20, %v836_v26  ;;  %v3254_v26 = vpack.c.bf16 %v4571_v59, %v4570_v39  ;;  %v4572_v20 = vand.u32 4294901760, %v4568_v31  ;;  %v4578_v31 = vand.u32 4294901760, %v4019_v48 }
 0x19d   :  { %3211 = vmatprep.subr.bf16.mxu1 %v4559_v1  ;;  %v1449_v48 = vand.u32 4294901760, %v1399_v52 }
 0x19e   :  { %3309 = vmatpush3.bf16.msra.mxu0 %v4182_v16  ;;  %v3257_v8 = vpack.c.bf16 %v4573_v54, %v4572_v20  ;;  %v1531_v20 = vand.u32 4294901760, %v4144_v13  ;;  %v1538_v54 = vand.u32 4294901760, %v4150_v12 }
 0x19f   :  { %3310 = vmatprep.subr.bf16.mxu0 %v4559_v1  ;;  %v4306_v5 = vsub.f32 %v1399_v52, %v1449_v48 }
 0x1a0   :  { %3213 = vmatpush3.bf16.msra.mxu1 %v3212_v37  ;;  %v3251_v37 = vpack.c.bf16 %v857_v44, %v850_v24  ;;  %v4574_v24 = vand.u32 4294901760, %v4010_v38  ;;  %v4575_v44 = vand.u32 4294901760, %v4012_v15  ;;  %v4580_v38 = vand.u32 4294901760, %v4023_v0 }
 0x1a1   :  { %3214 = vmatprep.subr.bf16.mxu1 %v4559_v1  ;;  %v4581_v15 = vand.u32 4294901760, %v4025_v61  ;;  %v1452_v0 = vand.u32 4294901760, %v1400_v34 }
 0x1a3   :  { %v4309_v47 = vsub.f32 %v1400_v34, %v1452_v0 }
 0x1a4   :  { %3216 = vmatpush3.bf16.msra.mxu1 %v3215_v60  ;;  %v3266_v60 = vpack.c.bf16 %v4579_v58, %v4578_v31  ;;  %v1545_v31 = vand.u32 4294901760, %v4154_v19  ;;  %v1552_v58 = vand.u32 4294901760, %v4156_v30 }
 0x1a5   :  { %3217 = vmatprep.subr.bf16.mxu1 %v4559_v1 }
 0x1a8   :  { %3219 = vmatpush3.bf16.msra.mxu1 %v3218_v18  ;;  %v3269_v18 = vpack.c.bf16 %v4581_v15, %v4580_v38  ;;  %v1546_v38 = vsub.f32 %v4154_v19, %v1545_v31  ;;  %v1553_v15 = vsub.f32 %v4156_v30, %v1552_v58 }
 0x1a9   :  { %3220 = vmatprep.subr.bf16.mxu1 %v4559_v1 }
 0x1ac   :  { %3222 = vmatpush3.bf16.msra.mxu1 %v3221_v23  ;;  %v1510_v23 = vand.u32 4294901760, %v4136_v9 }
 0x1ad   :  { %3223 = vmatprep.subr.bf16.mxu1 %v4559_v1 }
 0x1ae   :  { %v1511_v4 = vsub.f32 %v4136_v9, %v1510_v23 }
 0x1af   :  { %2690 = vmatmul.mubr.f32.vlgmr.msra.gmra.mrb[2].mxu1 %v4110_v35  ;;  %v3263_v35 = vpack.c.bf16 %v4577_v40, %v4576_v53 }
 0x1b0   :  { %3225 = vmatpush3.bf16.msra.mxu1 %v3952_v36  ;;  %2724 = vmatprep.mubr.msk.f32.mxu1 %vm3556_vm0, %v4554_v14  ;;  %v1512_v3 = vand.u32 4294901760, %v1511_v4 }
 0x1b1   :  { %3226 = vmatprep.subr.bf16.mxu1 %v4559_v1 }
 0x1b4   :  { %3228 = vmatpush3.bf16.msra.mxu1 %v3963_v49 }
 0x1b5   :  { %3229 = vmatprep.subr.bf16.mxu1 %v4559_v1 }
 0x1b8   :  { %3231 = vmatpush3.bf16.msra.mxu1 %v3975_v56 }
 0x1b9   :  { %3232 = vmatprep.subr.bf16.mxu1 %v4559_v1 }
 0x1bc   :  { %3234 = vmatpush3.bf16.msra.mxu1 %v3983_v2 }
 0x1bd   :  { %3235 = vmatprep.subr.bf16.mxu1 %v4559_v1 }
 0x1c0   :  { %3237 = vmatpush3.bf16.msra.mxu1 %v3988_v7 }
 0x1c1   :  { %3238 = vmatprep.subr.bf16.mxu1 %v4559_v1 }
 0x1c4   :  { %3240 = vmatpush3.bf16.msra.mxu1 %v3992_v25 }
 0x1c5   :  { %3241 = vmatprep.subr.bf16.mxu1 %v4559_v1 }
 0x1c8   :  { %3243 = vmatpush3.bf16.msra.mxu1 %v3996_v45 }
 0x1c9   :  { %3244 = vmatprep.subr.bf16.mxu1 %v4559_v1 }
 0x1cc   :  { %3246 = vmatpush3.bf16.msra.mxu1 %v4002_v57 }
 0x1cd   :  { %3247 = vmatprep.subr.bf16.mxu1 %v4559_v1 }
 0x1cf   :  { %2725 = vmatmul.mubr.f32.vlgmr.msra.gmra.mrb[2].mxu1 %v825_v46  ;;  %v3260_v46 = vpack.c.bf16 %v4575_v44, %v4574_v24  ;;  %v1532_v44 = vsub.f32 %v4144_v13, %v1531_v20 }
 0x1d0   :  { %3249 = vmatpush3.bf16.msra.mxu1 %v3248_v62  ;;  %2759 = vmatprep.mubr.msk.f32.mxu1 %vm3556_vm0, %v4554_v14  ;;  %v1517_v62 = vand.u32 4294901760, %v4138_v50 }
 0x1d1   :  { %3250 = vmatprep.subr.bf16.mxu1 %v4559_v1  ;;  %v1533_v40 = vand.u32 4294901760, %v1532_v44 }
 0x1d2   :  { %v1518_v59 = vsub.f32 %v4138_v50, %v1517_v62 }
 0x1d4   :  { %3252 = vmatpush3.bf16.msra.mxu1 %v3251_v37  ;;  %v1524_v37 = vand.u32 4294901760, %v4142_v42 }
 0x1d5   :  { %3253 = vmatprep.subr.bf16.mxu1 %v4559_v1 }
 0x1d8   :  { %3255 = vmatpush3.bf16.msra.mxu1 %v3254_v26  ;;  %v1525_v26 = vsub.f32 %v4142_v42, %v1524_v37 }
 0x1d9   :  { %3256 = vmatprep.subr.bf16.mxu1 %v4559_v1 }
 0x1da   :  { %v1526_v24 = vand.u32 4294901760, %v1525_v26 }
 0x1dc   :  { %3258 = vmatpush3.bf16.msra.mxu1 %v3257_v8  ;;  %v1519_v8 = vand.u32 4294901760, %v1518_v59  ;;  %v4549_v59 = vand.u32 4294901760, %v4306_v5 }
 0x1dd   :  { %3259 = vmatprep.subr.bf16.mxu1 %v4559_v1 }
 0x1de   :  { %v3323_v53 = vpack.c.bf16 %v1526_v24, %v1519_v8  ;;  %v1595_v24 = vsub.f32 %v4306_v5, %v4549_v59 }
 0x1e0   :  { %3261 = vmatpush3.bf16.msra.mxu1 %v3260_v46  ;;  %v1539_v46 = vsub.f32 %v4150_v12, %v1538_v54 }
 0x1e1   :  { %3262 = vmatprep.subr.bf16.mxu1 %v4559_v1 }
 0x1e4   :  { %3264 = vmatpush3.bf16.msra.mxu1 %v3263_v35  ;;  %v1540_v35 = vand.u32 4294901760, %v1539_v46  ;;  %v1596_v46 = vand.u32 4294901760, %v1595_v24 }
 0x1e5   :  { %3265 = vmatprep.subr.bf16.mxu1 %v4559_v1 }
 0x1e8   :  { %3267 = vmatpush3.bf16.msra.mxu1 %v3266_v60  ;;  %v3326_v60 = vpack.c.bf16 %v1540_v35, %v1533_v40  ;;  %v4548_v40 = vand.u32 4294901760, %v4309_v47 }
 0x1e9   :  { %3268 = vmatprep.subr.bf16.mxu1 %v4559_v1 }
 0x1ec   :  { %3270 = vmatpush3.bf16.msra.mxu1 %v3269_v18  ;;  %v1547_v18 = vand.u32 4294901760, %v1546_v38 }
 0x1ed   :  { %3271 = vmatprep.subr.bf16.mxu1 %v4559_v1 }
 0x1ef   :  { %2760 = vmatmul.mubr.f32.vlgmr.msra.gmra.mrb[2].mxu1 %v4107_v22 }
 0x1f0   :  { %3273 = vmatpush3.bf16.msra.mxu1 %v3952_v36  ;;  %2794 = vmatprep.mubr.msk.f32.mxu1 %vm3556_vm0, %v4554_v14  ;;  %v1396_v36 = vld [vmem:[#allocation6 + $0x50] sm:$0xff] }
 0x1f1   :  { %3274 = vmatprep.subr.bf16.mxu1 %v4559_v1 }
 0x1f4   :  { %3276 = vmatpush3.bf16.msra.mxu1 %v3963_v49  ;;  %v1397_v49 = vld [vmem:[#allocation6 + $0x58] sm:$0xff] }
 0x1f5   :  { %3277 = vmatprep.subr.bf16.mxu1 %v4559_v1 }
 0x1f8   :  { %3279 = vmatpush3.bf16.msra.mxu1 %v3975_v56  ;;  %v1440_v56 = vand.u32 4294901760, %v1396_v36 }
 0x1f9   :  { %3280 = vmatprep.subr.bf16.mxu1 %v4559_v1 }
 0x1fa   :  { %v4300_v51 = vsub.f32 %v1396_v36, %v1440_v56  ;;  %v1554_v36 = vand.u32 4294901760, %v1553_v15  ;;  %v1602_v15 = vsub.f32 %v4309_v47, %v4548_v40 }
 0x1fc   :  { %3282 = vmatpush3.bf16.msra.mxu1 %v3983_v2  ;;  %v1443_v2 = vand.u32 4294901760, %v1397_v49  ;;  %v1573_v34 = vand.u32 4294901760, %v4300_v51 }
 0x1fd   :  { %3283 = vmatprep.subr.bf16.mxu1 %v4559_v1 }
 0x1fe   :  { %v4282_v29 = vpack.c.bf16 %v1443_v2, %v1440_v56  ;;  %v4302_v28 = vsub.f32 %v1397_v49, %v1443_v2  ;;  %v1559_v49 = vand.u32 4294901760, %v4158_v21  ;;  %v1566_v56 = vand.u32 4294901760, %v4160_v27 }
 0x1ff   :  { %v3329_v2 = vpack.c.bf16 %v1554_v36, %v1547_v18  ;;  %v1603_v36 = vand.u32 4294901760, %v1602_v15 }
 0x200   :  { %3285 = vmatpush3.bf16.msra.mxu1 %v3988_v7  ;;  %v1398_v7 = vld [vmem:[#allocation6 + $0x60] sm:$0xff]  ;;  %3312 = vmatpush3.bf16.msra.mxu0 %v4282_v29  ;;  %v1567_v52 = vsub.f32 %v4160_v27, %v1566_v56 }
 0x201   :  { %3286 = vmatprep.subr.bf16.mxu1 %v4559_v1  ;;  %3313 = vmatprep.subr.bf16.mxu0 %v4559_v1 }
 0x204   :  { %3288 = vmatpush3.bf16.msra.mxu1 %v3992_v25  ;;  %v1446_v25 = vand.u32 4294901760, %v1398_v7 }
 0x205   :  { %3289 = vmatprep.subr.bf16.mxu1 %v4559_v1 }
 0x206   :  { %v4304_v32 = vsub.f32 %v1398_v7, %v1446_v25  ;;  %v1560_v7 = vsub.f32 %v4158_v21, %v1559_v49 }
 0x208   :  { %3291 = vmatpush3.bf16.msra.mxu1 %v3996_v45  ;;  %v4286_v45 = vpack.c.bf16 %v1449_v48, %v1446_v25  ;;  %v1561_v25 = vand.u32 4294901760, %v1560_v7  ;;  %v1568_v48 = vand.u32 4294901760, %v1567_v52 }
 0x209   :  { %3292 = vmatprep.subr.bf16.mxu1 %v4559_v1 }
 0x20a   :  { %3315 = vmatpush3.bf16.msra.mxu0 %v4286_v45 }
 0x20b   :  { %3316 = vmatprep.subr.bf16.mxu0 %v4559_v1 }
 0x20c   :  { %3294 = vmatpush3.bf16.msra.mxu1 %v4002_v57  ;;  %v1401_v57 = vld [vmem:[#allocation6 + $0x78] sm:$0xff] }
 0x20d   :  { %v1455_v61 = vand.u32 4294901760, %v1401_v57 }
 0x20f   :  { %2795 = vmatmul.mubr.f32.vlgmr.msra.gmra.mrb[2].mxu1 %v4107_v22  ;;  %v1503_v22 = vand.u32 4294901760, %v4134_v55  ;;  %v4292_v41 = vpack.c.bf16 %v1455_v61, %v1452_v0  ;;  %v4311_v33 = vsub.f32 %v1401_v57, %v1455_v61  ;;  %v1580_v57 = vand.u32 4294901760, %v4302_v28 }
 0x210   :  { %v3332_v0 = vpack.c.bf16 %v1568_v48, %v1561_v25  ;;  %v1574_v61 = vsub.f32 %v4300_v51, %v1573_v34  ;;  %v3344_v25 = vpack.c.bf16 %v4136_v9, %v4134_v55  ;;  %v3347_v48 = vpack.c.bf16 %v4142_v42, %v4138_v50 }
 0x211   :  { %v1504_v43 = vsub.f32 %v4134_v55, %v1503_v22  ;;  %3318 = vmatpush3.bf16.msra.mxu0 %v4292_v41  ;;  %v4547_v35 = vand.u32 4294901760, %v4311_v33  ;;  %v3365_v24 = vpack.c.bf16 %v4311_v33, %v4309_v47  ;;  %v3398_v55 = vpack.c.bf16 %v1538_v54, %v1531_v20 }
 0x212   :  { %3319 = vmatprep.subr.bf16.mxu0 %v4559_v1  ;;  %v1575_v4 = vand.u32 4294901760, %v1574_v61  ;;  %v3350_v61 = vpack.c.bf16 %v4150_v12, %v4144_v13  ;;  %v3401_v42 = vpack.c.bf16 %v1552_v58, %v1545_v31  ;;  %v3404_v9 = vpack.c.bf16 %v1566_v56, %v1559_v49 }
 0x213   :  { %v1505_v17 = vand.u32 4294901760, %v1504_v43  ;;  %v1581_v43 = vsub.f32 %v4302_v28, %v1580_v57  ;;  %v1609_v18 = vsub.f32 %v4311_v33, %v4547_v35  ;;  %v3407_v12 = vpack.c.bf16 %v1580_v57, %v1573_v34 }
 0x214   :  { %v4582_v13 = vand.u32 4294901760, %v4304_v32  ;;  %v4583_v50 = vand.u32 4294901760, %v4306_v5 }
 0x215   :  { %v4316_v39 = vpack.c.bf16 %v1512_v3, %v1505_v17  ;;  %v1582_v17 = vand.u32 4294901760, %v1581_v43  ;;  %v4550_v3 = vand.u32 4294901760, %v4304_v32  ;;  %v1610_v7 = vand.u32 4294901760, %v1609_v18 }
 0x216   :  { %v3353_v43 = vpack.c.bf16 %v4156_v30, %v4154_v19  ;;  %v3410_v19 = vpack.c.bf16 %v4583_v50, %v4582_v13  ;;  %v4584_v30 = vand.u32 4294901760, %v4309_v47 }
 0x217   :  { %v3335_v26 = vpack.c.bf16 %v1582_v17, %v1575_v4  ;;  %v1588_v8 = vsub.f32 %v4304_v32, %v4550_v3  ;;  %v3341_v52 = vpack.c.bf16 %v1610_v7, %v1603_v36  ;;  %v3356_v4 = vpack.c.bf16 %v4160_v27, %v4158_v21 }
 0x218   :  { %v3359_v17 = vpack.c.bf16 %v4302_v28, %v4300_v51  ;;  %v4585_v21 = vand.u32 4294901760, %v4311_v33 }
 0x219   :  { %v1589_v44 = vand.u32 4294901760, %v1588_v8  ;;  %v3362_v8 = vpack.c.bf16 %v4306_v5, %v4304_v32 }
 0x21a   :  { %v3413_v27 = vpack.c.bf16 %v4585_v21, %v4584_v30 }
 0x21b   :  { %v3338_v38 = vpack.c.bf16 %v1596_v46, %v1589_v44  ;;  %v2069_v44 = vld [vmem:[%s4512_s2 + $0x1] ss:$0 sm:$0xff] }
 0x2e2   :  { %v1379_v46 = vpop.f32.mrb[2].mxu1 }
 0x2e3   :  { %v3441_v15 = vadd.f32 %v2069_v44, %v1379_v46  ;;  %v2796_v18 = vpop.f32.mrb[3].mxu1 }
 0x2e5   :  { %v1383_v36 = vmax.f32 %v3441_v15, 0.0 }
 0x2e7   :  { %v4391_v7 = vand.u32 4294901760, %v1383_v36 }
 0x2e9   :  { %v1491_v35 = vsub.f32 %v1383_v36, %v4391_v7 }
 0x2eb   :  { %v1492_v40 = vand.u32 4294901760, %v1491_v35 }
 0x2ed   :  { %v1493_v59 = vsub.f32 %v1491_v35, %v1492_v40 }
 0x2ef   :  { %v1494_v3 = vand.u32 4294901760, %v1493_v59 }
 0x2f1   :  { %2830 = vmatmul.mubr.f32.vlgmr.msra.gmra.mrb[2].mxu0 %v1494_v3 }
 0x2f2   :  { %3321 = vmatpush3.bf16.msra.mxu0 %v4316_v39  ;;  %2864 = vmatprep.mubr.msk.f32.mxu0 %vm3556_vm0, %v4554_v14  ;;  %v3392_v39 = vpack.c.bf16 %v1510_v23, %v1503_v22 }
 0x2f3   :  { %3322 = vmatprep.subr.bf16.mxu0 %v4559_v1 }
 0x2f6   :  { %3324 = vmatpush3.bf16.msra.mxu0 %v3323_v53  ;;  %v3395_v53 = vpack.c.bf16 %v1524_v37, %v1517_v62 }
 0x2f7   :  { %3325 = vmatprep.subr.bf16.mxu0 %v4559_v1 }
 0x2fa   :  { %3327 = vmatpush3.bf16.msra.mxu0 %v3326_v60 }
 0x2fb   :  { %3328 = vmatprep.subr.bf16.mxu0 %v4559_v1 }
 0x2fe   :  { %3330 = vmatpush3.bf16.msra.mxu0 %v3329_v2 }
 0x2ff   :  { %3331 = vmatprep.subr.bf16.mxu0 %v4559_v1 }
 0x302   :  { %3333 = vmatpush3.bf16.msra.mxu0 %v3332_v0 }
 0x303   :  { %3334 = vmatprep.subr.bf16.mxu0 %v4559_v1 }
 0x306   :  { %3336 = vmatpush3.bf16.msra.mxu0 %v3335_v26 }
 0x307   :  { %3337 = vmatprep.subr.bf16.mxu0 %v4559_v1 }
 0x30a   :  { %3339 = vmatpush3.bf16.msra.mxu0 %v3338_v38 }
 0x30b   :  { %3340 = vmatprep.subr.bf16.mxu0 %v4559_v1 }
 0x30e   :  { %3342 = vmatpush3.bf16.msra.mxu0 %v3341_v52 }
 0x30f   :  { %3343 = vmatprep.subr.bf16.mxu0 %v4559_v1 }
 0x311   :  { %2865 = vmatmul.mubr.f32.vlgmr.msra.gmra.mrb[2].mxu0 %v4391_v7 }
 0x312   :  { %3345 = vmatpush3.bf16.msra.mxu0 %v3344_v25  ;;  %2899 = vmatprep.mubr.msk.f32.mxu0 %vm3556_vm0, %v4554_v14 }
 0x313   :  { %3346 = vmatprep.subr.bf16.mxu0 %v4559_v1 }
 0x316   :  { %3348 = vmatpush3.bf16.msra.mxu0 %v3347_v48 }
 0x317   :  { %3349 = vmatprep.subr.bf16.mxu0 %v4559_v1 }
 0x31a   :  { %3351 = vmatpush3.bf16.msra.mxu0 %v3350_v61 }
 0x31b   :  { %3352 = vmatprep.subr.bf16.mxu0 %v4559_v1 }
 0x31e   :  { %3354 = vmatpush3.bf16.msra.mxu0 %v3353_v43 }
 0x31f   :  { %3355 = vmatprep.subr.bf16.mxu0 %v4559_v1 }
 0x322   :  { %3357 = vmatpush3.bf16.msra.mxu0 %v3356_v4 }
 0x323   :  { %3358 = vmatprep.subr.bf16.mxu0 %v4559_v1 }
 0x326   :  { %3360 = vmatpush3.bf16.msra.mxu0 %v3359_v17 }
 0x327   :  { %3361 = vmatprep.subr.bf16.mxu0 %v4559_v1 }
 0x32a   :  { %3363 = vmatpush3.bf16.msra.mxu0 %v3362_v8 }
 0x32b   :  { %3364 = vmatprep.subr.bf16.mxu0 %v4559_v1 }
 0x32e   :  { %3366 = vmatpush3.bf16.msra.mxu0 %v3365_v24 }
 0x32f   :  { %3367 = vmatprep.subr.bf16.mxu0 %v4559_v1 }
 0x331   :  { %2900 = vmatmul.mubr.f32.vlgmr.msra.gmra.mrb[2].mxu0 %v1491_v35 }
 0x332   :  { %3369 = vmatpush3.bf16.msra.mxu0 %v4132_v6  ;;  %2934 = vmatprep.mubr.msk.f32.mxu0 %vm3556_vm0, %v4554_v14 }
 0x333   :  { %3370 = vmatprep.subr.bf16.mxu0 %v4559_v1 }
 0x336   :  { %3372 = vmatpush3.bf16.msra.mxu0 %v4140_v63 }
 0x337   :  { %3373 = vmatprep.subr.bf16.mxu0 %v4559_v1 }
 0x33a   :  { %3375 = vmatpush3.bf16.msra.mxu0 %v4166_v11 }
 0x33b   :  { %3376 = vmatprep.subr.bf16.mxu0 %v4559_v1 }
 0x33e   :  { %3378 = vmatpush3.bf16.msra.mxu0 %v4174_v10 }
 0x33f   :  { %3379 = vmatprep.subr.bf16.mxu0 %v4559_v1 }
 0x342   :  { %3381 = vmatpush3.bf16.msra.mxu0 %v4182_v16 }
 0x343   :  { %3382 = vmatprep.subr.bf16.mxu0 %v4559_v1 }
 0x346   :  { %3384 = vmatpush3.bf16.msra.mxu0 %v4282_v29 }
 0x347   :  { %3385 = vmatprep.subr.bf16.mxu0 %v4559_v1 }
 0x34a   :  { %3387 = vmatpush3.bf16.msra.mxu0 %v4286_v45 }
 0x34b   :  { %3388 = vmatprep.subr.bf16.mxu0 %v4559_v1 }
 0x34e   :  { %3390 = vmatpush3.bf16.msra.mxu0 %v4292_v41 }
 0x34f   :  { %3391 = vmatprep.subr.bf16.mxu0 %v4559_v1 }
 0x351   :  { %2935 = vmatmul.mubr.f32.vlgmr.msra.gmra.mrb[2].mxu0 %v1492_v40 }
 0x352   :  { %3393 = vmatpush3.bf16.msra.mxu0 %v3392_v39  ;;  %2969 = vmatprep.mubr.msk.f32.mxu0 %vm3556_vm0, %v4554_v14 }
 0x353   :  { %3394 = vmatprep.subr.bf16.mxu0 %v4559_v1 }
 0x356   :  { %3396 = vmatpush3.bf16.msra.mxu0 %v3395_v53 }
 0x357   :  { %3397 = vmatprep.subr.bf16.mxu0 %v4559_v1 }
 0x35a   :  { %3399 = vmatpush3.bf16.msra.mxu0 %v3398_v55 }
 0x35b   :  { %3400 = vmatprep.subr.bf16.mxu0 %v4559_v1 }
 0x35e   :  { %3402 = vmatpush3.bf16.msra.mxu0 %v3401_v42 }
 0x35f   :  { %3403 = vmatprep.subr.bf16.mxu0 %v4559_v1 }
 0x362   :  { %3405 = vmatpush3.bf16.msra.mxu0 %v3404_v9 }
 0x363   :  { %3406 = vmatprep.subr.bf16.mxu0 %v4559_v1 }
 0x366   :  { %3408 = vmatpush3.bf16.msra.mxu0 %v3407_v12 }
 0x367   :  { %3409 = vmatprep.subr.bf16.mxu0 %v4559_v1 }
 0x36a   :  { %3411 = vmatpush3.bf16.msra.mxu0 %v3410_v19 }
 0x36b   :  { %3412 = vmatprep.subr.bf16.mxu0 %v4559_v1 }
 0x36e   :  { %3414 = vmatpush3.bf16.msra.mxu0 %v3413_v27 }
 0x36f   :  { %3415 = vmatprep.subr.bf16.mxu0 %v4559_v1 }
 0x371   :  { %2970 = vmatmul.mubr.f32.vlgmr.msra.gmra.mrb[2].mxu0 %v4391_v7 }
 0x372   :  { %3417 = vmatpush3.bf16.msra.mxu0 %v4132_v6  ;;  %3004 = vmatprep.mubr.msk.f32.mxu0 %vm3556_vm0, %v4554_v14  ;;  %v2070_v14 = vld [vmem:[%s4514_s4] ss:$0 sm:$0xff] }
 0x373   :  { %3418 = vmatprep.subr.bf16.mxu0 %v4559_v1 }
 0x376   :  { %3420 = vmatpush3.bf16.msra.mxu0 %v4140_v63 }
 0x377   :  { %3421 = vmatprep.subr.bf16.mxu0 %v4559_v1 }
 0x37a   :  { %3423 = vmatpush3.bf16.msra.mxu0 %v4166_v11 }
 0x37b   :  { %3424 = vmatprep.subr.bf16.mxu0 %v4559_v1 }
 0x37e   :  { %3426 = vmatpush3.bf16.msra.mxu0 %v4174_v10 }
 0x37f   :  { %3427 = vmatprep.subr.bf16.mxu0 %v4559_v1 }
 0x382   :  { %3429 = vmatpush3.bf16.msra.mxu0 %v4182_v16 }
 0x383   :  { %3430 = vmatprep.subr.bf16.mxu0 %v4559_v1 }
 0x386   :  { %3432 = vmatpush3.bf16.msra.mxu0 %v4282_v29 }
 0x387   :  { %3433 = vmatprep.subr.bf16.mxu0 %v4559_v1 }
 0x38a   :  { %3435 = vmatpush3.bf16.msra.mxu0 %v4286_v45 }
 0x38b   :  { %3436 = vmatprep.subr.bf16.mxu0 %v4559_v1 }
 0x38e   :  { %3438 = vmatpush3.bf16.msra.mxu0 %v4292_v41 }
 0x391   :  { %3005 = vmatmul.mubr.f32.vlgmr.msra.gmra.mrb[2].mxu0 %v4391_v7 }
 0x464   :  { %v2046_v63 = vpop.f32.mrb[2].mxu0 }
 0x465   :  { %v3442_v6 = vadd.f32 %v2070_v14, %v2046_v63  ;;  %v3006_v11 = vpop.f32.mrb[3].mxu0 }
 0x467   :  { %2050 = vst [vmem:[#allocation8] sm:$0xff] %v3442_v6 }
 0x468   :  { %3534 = shalt.err (!%p3531_p6)
}
 0x469   :  { %s3535_s28 = scalar_lea.hbm %s4515_s5, 128 }
 0x46a   :  { %p3536_p7 = scmp.ne.s32.totalorder %s4515_s5, %s3535_s28  ;;  %p3539_p8 = scmp.lt.u32.totalorder %s3535_s28, %s4515_s5 }
 0x46c   :  { %p3541_p9 = pnand %p3539_p8, %p3536_p7 }
 0x46e   :  { %3544 = shalt.err (!%p3541_p9)
}
 0x46f   :  { %2060 = dma.vmem_to_hbm [thread:$0]  %s2058_s24, 128, %s4515_s5, [#allocation5]  }
 0x470   :  { %3549 = dma.done.wait [#allocation5], 128  }
 0x471   :  { %3550 = vsyncadd [#allocation5], 4294967168 }
 0x472   :  { %2064 = vsyncpa [#allocation4], 1 }
 0x473   :  { %2065 = vsyncpa [#allocation7], 1 }
 0x474   :  { %2066 = vsyncpa [#allocation5], 1 }

</bundles_post_ra>
